<compile_context>
chip_gen: v7x
topology: tpu7x:2x2x1
jax: 0.10.0
libtpu: 0.0.40
codegen_flags: <defaults>
</compile_context>

<pallas_src>
import functools

import numpy as np
import jax
import jax.numpy as jnp
from jax.experimental import pallas as pl
from jax.experimental.pallas import tpu as pltpu


# --------------------------------------------------------------------------
# Fused Pallas kernel: deconv -> (concat) conv1 + ReLU -> conv2 + ReLU
# Rows = (image, pair-row) flattened (M = B*H, multiple of H).
# Lanes = (row-parity, column, channel).
# --------------------------------------------------------------------------
def _fused_decoder_kernel(x_ref, y_ref, wdec_ref, bdec_ref, k1_ref, b1_ref,
                          k2_ref, b2_ref, o_ref, *, H, Lm, Lo):
    f32 = jnp.float32
    bf16 = jnp.bfloat16
    M = x_ref.shape[0]

    # Per-image pair-row boundary masks.  M is a multiple of H, so (row % H) is the
    # in-image pair-row index even with the batch folded into the row dimension.
    row = jax.lax.broadcasted_iota(jnp.int32, (M, 1), 0)
    not_first = (row % H) != 0          # destination has a pair-row above it (same image)
    not_last = (row % H) != (H - 1)     # destination has a pair-row below it (same image)

    def from_above(p):
        # out[i] <- p[i-1]; zero the first pair-row of every image (incl. global wrap).
        return jnp.where(not_first, pltpu.roll(p, shift=1, axis=0), 0.0)

    def from_below(p):
        # out[i] <- p[i+1]; zero the last pair-row of every image (incl. global wrap).
        return jnp.where(not_last, pltpu.roll(p, shift=M - 1, axis=0), 0.0)

    # ---- (1) ConvTranspose2d(k=2, s=2): a single banded matmul ----------------------
    up = (jnp.dot(x_ref[...], wdec_ref[...], preferred_element_type=f32)
          + bdec_ref[...]).astype(bf16)

    # ---- (2) Conv3x3(cat([up, skip])) + ReLU -----------------------------------------
    # Channel concat folded into the contraction (K = Lu + Ls = 256) and the 3 pair-row
    # taps stacked along N (N = 3*Lm): one MXU dispatch, then lane-slice + roll + mask.
    cat = jnp.concatenate([up, y_ref[...]], axis=-1)
    t1 = jnp.dot(cat, k1_ref[...], preferred_element_type=f32)        # (M, 3*Lm)
    acc = (t1[:, Lm:2 * Lm]                                            # tap  0
           + from_above(t1[:, 0:Lm])                                   # tap -1
           + from_below(t1[:, 2 * Lm:3 * Lm]))                         # tap +1
    h1 = jnp.maximum(acc + b1_ref[...], 0.0).astype(bf16)

    # ---- (3) Conv3x3 + ReLU ------------------------------------------------------------
    t2 = jnp.dot(h1, k2_ref[...], preferred_element_type=f32)         # (M, 3*Lo)
    acc2 = (t2[:, Lo:2 * Lo]
            + from_above(t2[:, 0:Lo])
            + from_below(t2[:, 2 * Lo:3 * Lo]))
    o_ref[...] = jnp.maximum(acc2 + b2_ref[...], 0.0).astype(o_ref.dtype)


# --------------------------------------------------------------------------
# Host-side (one-time) weight packing: banded matrices in paired-row layout
# --------------------------------------------------------------------------
def _build_deconv_band(wt, W):
    # wt: (Cin, Cout, 2, 2) -> (W*Cin, 2*(2W)*Cout); columns ordered (parity, col, chan).
    Cin, Cout = wt.shape[0], wt.shape[1]
    Wo = 2 * W
    Wd = np.zeros((W * Cin, 2 * Wo * Cout), np.float32)
    for a in range(2):                       # output row parity
        for j in range(W):                   # input column
            for dj in range(2):              # output column offset
                col = (a * Wo + 2 * j + dj) * Cout
                Wd[j * Cin:(j + 1) * Cin, col:col + Cout] = wt[:, :, a, dj]
    return Wd


def _build_conv_band(w, Wo):
    # w: (Co, Ci, 3, 3) OIHW -> K: (3, 2*Wo*Ci, 2*Wo*Co), leading dim = pair-row tap (-1,0,+1).
    Co, Ci = w.shape[0], w.shape[1]
    K = np.zeros((3, 2 * Wo * Ci, 2 * Wo * Co), np.float32)
    for ti, t in enumerate((-1, 0, 1)):          # source pair-row offset vs destination
        for a_dst in range(2):                   # destination row parity
            for a_src in range(2):               # source row parity
                dy = 2 * t + a_src - a_dst
                if dy < -1 or dy > 1:
                    continue
                for j_dst in range(Wo):
                    for dx in (-1, 0, 1):
                        j_src = j_dst + dx
                        if j_src < 0 or j_src >= Wo:   # width zero-pad: drop entry
                            continue
                        r = (a_src * Wo + j_src) * Ci
                        c = (a_dst * Wo + j_dst) * Co
                        K[ti, r:r + Ci, c:c + Co] = w[:, :, dy + 1, dx + 1].T
    return K


def pack_source_decoder_params(wt, bt, w1, b1, w2, b2, in_height, in_width):
    """One-time, host-side packing (numpy). Never runs inside the jitted forward."""
    wt = np.asarray(wt, np.float32)
    bt = np.asarray(bt, np.float32)
    w1 = np.asarray(w1, np.float32)
    b1 = np.asarray(b1, np.float32)
    w2 = np.asarray(w2, np.float32)
    b2 = np.asarray(b2, np.float32)
    Cout = wt.shape[1]
    W = in_width
    Wo = 2 * W

    # conv1: fuse the channel-concat into the contraction dim, then stack the 3 pair-row
    # taps along N -> (Lu+Ls, 3*Lm).  conv2: stack taps along N -> (Lm, 3*Lo).
    k1u = _build_conv_band(w1[:, :Cout], Wo)                 # upsampled channels
    k1s = _build_conv_band(w1[:, Cout:], Wo)                 # skip channels
    k1 = np.concatenate([k1u, k1s], axis=1)                  # (3, Lu+Ls, Lm)
    k1 = np.concatenate([k1[0], k1[1], k1[2]], axis=1)       # (Lu+Ls, 3*Lm)
    k2 = _build_conv_band(w2, Wo)
    k2 = np.concatenate([k2[0], k2[1], k2[2]], axis=1)       # (Lm, 3*Lo)

    return {
        "wdec": jnp.asarray(_build_deconv_band(wt, W), jnp.bfloat16),  # (W*Cin, Lu)
        "bdec": jnp.asarray(np.tile(bt, 2 * Wo)[None, :]),             # f32 (1, Lu)
        "k1": jnp.asarray(k1, jnp.bfloat16),                           # (Lu+Ls, 3*Lm)
        "b1": jnp.asarray(np.tile(b1, 2 * Wo)[None, :]),               # f32 (1, Lm)
        "k2": jnp.asarray(k2, jnp.bfloat16),                           # (Lm, 3*Lo)
        "b2": jnp.asarray(np.tile(b2, 2 * Wo)[None, :]),               # f32 (1, Lo)
    }


# --------------------------------------------------------------------------
# Forward pass (NCHW in / NCHW out, like the PyTorch module) -- jittable
# --------------------------------------------------------------------------
def source_decoder_forward(x_nchw, y_nchw, params):
    B, Cin, H, W = x_nchw.shape
    Cs = y_nchw.shape[1]
    Ho, Wo = 2 * H, 2 * W
    Lu = params["bdec"].shape[-1]          # 2*Wo*Cout (deconv lanes)
    Lm = params["b1"].shape[-1]            # 2*Wo*Cout (conv1 lanes)
    Lo = params["b2"].shape[-1]            # 2*Wo*Cout (conv2 lanes)
    Ls = 2 * Wo * Cs                       # skip lanes
    Cout = Lo // (2 * Wo)
    M = B * H                              # batch folded into the matmul M dimension

    # NCHW -> paired-row layout (bf16 halves DMA bytes).
    # TODO(synk): if the producer can emit NHWC (or paired-row) directly, these two
    # XLA transpose passes disappear entirely.
    x2 = x_nchw.transpose(0, 2, 3, 1).reshape(M, W * Cin).astype(jnp.bfloat16)
    y2 = y_nchw.transpose(0, 2, 3, 1).reshape(M, Ls).astype(jnp.bfloat16)

    kernel = functools.partial(_fused_decoder_kernel, H=H, Lm=Lm, Lo=Lo)

    flops = (2 * M * (W * Cin) * Lu            # deconv
             + 2 * M * (Lu + Ls) * (3 * Lm)    # conv1 (K-fused, tap-stacked)
             + 2 * M * Lm * (3 * Lo))          # conv2 (tap-stacked)
    bytes_accessed = (x2.size * 2 + y2.size * 2
                      + params["wdec"].size * 2 + params["k1"].size * 2
                      + params["k2"].size * 2 + (Lu + Lm + Lo) * 4
                      + M * Lo * 2)

    out2 = pl.pallas_call(
        kernel,
        out_shape=jax.ShapeDtypeStruct((M, Lo), jnp.bfloat16),
        grid_spec=pltpu.PrefetchScalarGridSpec(
            num_scalar_prefetch=0,
            # Single grid step: at these sizes one block holds everything.  At
            # production sizes, add a row-tile axis over M (tile = multiple of H) and a
            # column-block axis over Wo for block-banded weights, and mark the
            # grid-invariant weight specs pipeline_mode=pl.Buffered(1).
            grid=(1,),
            in_specs=[
                pl.BlockSpec((M, W * Cin), lambda i: (0, 0)),        # x2
                pl.BlockSpec((M, Ls), lambda i: (0, 0)),             # y2 (skip)
                pl.BlockSpec((W * Cin, Lu), lambda i: (0, 0)),       # wdec
                pl.BlockSpec((1, Lu), lambda i: (0, 0)),             # bdec
                pl.BlockSpec((Lu + Ls, 3 * Lm), lambda i: (0, 0)),   # k1 (K-fused, tap-stacked)
                pl.BlockSpec((1, Lm), lambda i: (0, 0)),             # b1
                pl.BlockSpec((Lm, 3 * Lo), lambda i: (0, 0)),        # k2 (tap-stacked)
                pl.BlockSpec((1, Lo), lambda i: (0, 0)),             # b2
            ],
            out_specs=pl.BlockSpec((M, Lo), lambda i: (0, 0)),
        ),
        compiler_params=pltpu.CompilerParams(
            dimension_semantics=("arbitrary",),
        ),
        cost_estimate=pl.CostEstimate(flops=flops, transcendentals=0,
                                      bytes_accessed=bytes_accessed),
    )(x2, y2, params["wdec"], params["bdec"], params["k1"], params["b1"],
      params["k2"], params["b2"])

    # paired-row -> NHWC -> NCHW.  Reshape/transpose run on bf16; f32 cast is last.
    out = out2.reshape(B, Ho, Wo, Cout).transpose(0, 3, 1, 2)
    return out.astype(jnp.float32)


# --------------------------------------------------------------------------
# Pure-JAX reference (PyTorch semantics) for verification
# --------------------------------------------------------------------------
def reference_forward(x, y, wt, bt, w1, b1, w2, b2):
    B, Cin, H, W = x.shape
    Cout = wt.shape[1]
    u = jnp.einsum('bchw,code->bohdwe', x, wt)
    up = u.reshape(B, Cout, 2 * H, 2 * W) + bt[None, :, None, None]
    cat = jnp.concatenate([up, y], axis=1)

    def conv(xx, w, b):
        o = jax.lax.conv_general_dilated(xx, w, (1, 1), ((1, 1), (1, 1)),
                                         dimension_numbers=('NCHW', 'OIHW', 'NCHW'))
        return o + b[None, :, None, None]

    h = jnp.maximum(conv(cat, w1, b1), 0.0)
    h = jnp.maximum(conv(h, w2, b2), 0.0)
    return h


# --------------------------------------------------------------------------
if __name__ == "__main__":
    B, Cin, Cout, H, W = 2, 8, 4, 8, 8          # input_size=8, output_size=4
    Ho, Wo = 2 * H, 2 * W

    key = jax.random.PRNGKey(0)
    ks = jax.random.split(key, 8)
    x = jax.random.normal(ks[0], (B, Cin, H, W), jnp.float32)
    y = jax.random.normal(ks[1], (B, Cin - Cout, Ho, Wo), jnp.float32)   # skip connection

    # synthetic parameters with the PyTorch module's shapes
    wt = 0.1 * jax.random.normal(ks[2], (Cin, Cout, 2, 2), jnp.float32)  # ConvTranspose2d
    bt = 0.1 * jax.random.normal(ks[3], (Cout,), jnp.float32)
    w1 = 0.1 * jax.random.normal(ks[4], (Cout, Cin, 3, 3), jnp.float32)  # Conv2d(Cin->Cout)
    b1 = 0.1 * jax.random.normal(ks[5], (Cout,), jnp.float32)
    w2 = 0.1 * jax.random.normal(ks[6], (Cout, Cout, 3, 3), jnp.float32) # Conv2d(Cout->Cout)
    b2 = 0.1 * jax.random.normal(ks[7], (Cout,), jnp.float32)

    # One-time host-side packing (would break under jit if done inside the forward).
    params = pack_source_decoder_params(wt, bt, w1, b1, w2, b2, H, W)

    fwd = jax.jit(source_decoder_forward)
    out = jax.block_until_ready(fwd(x, y, params))

    ref = jax.block_until_ready(reference_forward(x, y, wt, bt, w1, b1, w2, b2))
    np.testing.assert_allclose(np.asarray(out), np.asarray(ref), rtol=5e-2, atol=5e-2)

    print("KERNEL_OK")
</pallas_src>

<mosaic_0001>
module attributes {stable_mosaic.version = 11 : i64} {
  func.func @_fused_decoder_kernel(%arg0: i32, %arg1: memref<16x64xbf16, #tpu.memory_space<vmem>>, %arg2: memref<16x128xbf16, #tpu.memory_space<vmem>>, %arg3: memref<64x128xbf16, #tpu.memory_space<vmem>>, %arg4: memref<1x128xf32, #tpu.memory_space<vmem>>, %arg5: memref<256x384xbf16, #tpu.memory_space<vmem>>, %arg6: memref<1x128xf32, #tpu.memory_space<vmem>>, %arg7: memref<128x384xbf16, #tpu.memory_space<vmem>>, %arg8: memref<1x128xf32, #tpu.memory_space<vmem>>, %arg9: memref<16x128xbf16, #tpu.memory_space<vmem>>) attributes {dimension_semantics = [#tpu.dimension_semantics<arbitrary>], iteration_bounds = array<i64: 1>, scalar_prefetch = 0 : i64, scratch_operands = 0 : i64, tpu.core_type = #tpu.core_type<tc>, window_params = [{pipeline_mode = #tpu.pipeline_mode<synchronous>, transform_indices = @transform_0, window_bounds = array<i64: 16, 64>}, {pipeline_mode = #tpu.pipeline_mode<synchronous>, transform_indices = @transform_1, window_bounds = array<i64: 16, 128>}, {pipeline_mode = #tpu.pipeline_mode<synchronous>, transform_indices = @transform_2, window_bounds = array<i64: 64, 128>}, {pipeline_mode = #tpu.pipeline_mode<synchronous>, transform_indices = @transform_3, window_bounds = array<i64: 1, 128>}, {pipeline_mode = #tpu.pipeline_mode<synchronous>, transform_indices = @transform_4, window_bounds = array<i64: 256, 384>}, {pipeline_mode = #tpu.pipeline_mode<synchronous>, transform_indices = @transform_5, window_bounds = array<i64: 1, 128>}, {pipeline_mode = #tpu.pipeline_mode<synchronous>, transform_indices = @transform_6, window_bounds = array<i64: 128, 384>}, {pipeline_mode = #tpu.pipeline_mode<synchronous>, transform_indices = @transform_7, window_bounds = array<i64: 1, 128>}, {pipeline_mode = #tpu.pipeline_mode<synchronous>, transform_indices = @transform_8, window_bounds = array<i64: 16, 128>}]} {
    %0 = tpu.iota {dimensions = array<i32: 0>} : vector<16x1xi32>
    %c8_i32 = arith.constant 8 : i32
    %c0_i32 = arith.constant 0 : i32
    %1 = arith.cmpi eq, %c8_i32, %c0_i32 : i32
    %c1_i32 = arith.constant 1 : i32
    %2 = arith.select %1, %c1_i32, %c8_i32 : i32
    %3 = vector.broadcast %2 : i32 to vector<16x1xi32>
    %4 = arith.remsi %0, %3 : vector<16x1xi32>
    %c0_i32_0 = arith.constant 0 : i32
    %5 = vector.broadcast %c0_i32_0 : i32 to vector<16x1xi32>
    %6 = arith.cmpi ne, %4, %5 : vector<16x1xi32>
    %c0_i32_1 = arith.constant 0 : i32
    %7 = vector.broadcast %c0_i32_1 : i32 to vector<16x1xi32>
    %8 = arith.cmpi slt, %4, %7 : vector<16x1xi32>
    %c0_i32_2 = arith.constant 0 : i32
    %9 = arith.cmpi slt, %2, %c0_i32_2 : i32
    %10 = vector.broadcast %9 : i1 to vector<16x1xi1>
    %11 = vector.broadcast %10 : vector<16x1xi1> to vector<16x1xi1>
    %12 = arith.xori %8, %11 : vector<16x1xi1>
    %13 = arith.andi %12, %6 : vector<16x1xi1>
    %14 = vector.broadcast %2 : i32 to vector<16x1xi32>
    %15 = arith.addi %4, %14 : vector<16x1xi32>
    %16 = arith.select %13, %15, %4 : vector<16x1xi1>, vector<16x1xi32>
    %c0_i32_3 = arith.constant 0 : i32
    %17 = vector.broadcast %c0_i32_3 : i32 to vector<16x1xi32>
    %18 = arith.cmpi ne, %16, %17 : vector<16x1xi32>
    %c8_i32_4 = arith.constant 8 : i32
    %c0_i32_5 = arith.constant 0 : i32
    %19 = arith.cmpi eq, %c8_i32_4, %c0_i32_5 : i32
    %c1_i32_6 = arith.constant 1 : i32
    %20 = arith.select %19, %c1_i32_6, %c8_i32_4 : i32
    %21 = vector.broadcast %20 : i32 to vector<16x1xi32>
    %22 = arith.remsi %0, %21 : vector<16x1xi32>
    %c0_i32_7 = arith.constant 0 : i32
    %23 = vector.broadcast %c0_i32_7 : i32 to vector<16x1xi32>
    %24 = arith.cmpi ne, %22, %23 : vector<16x1xi32>
    %c0_i32_8 = arith.constant 0 : i32
    %25 = vector.broadcast %c0_i32_8 : i32 to vector<16x1xi32>
    %26 = arith.cmpi slt, %22, %25 : vector<16x1xi32>
    %c0_i32_9 = arith.constant 0 : i32
    %27 = arith.cmpi slt, %20, %c0_i32_9 : i32
    %28 = vector.broadcast %27 : i1 to vector<16x1xi1>
    %29 = vector.broadcast %28 : vector<16x1xi1> to vector<16x1xi1>
    %30 = arith.xori %26, %29 : vector<16x1xi1>
    %31 = arith.andi %30, %24 : vector<16x1xi1>
    %32 = vector.broadcast %20 : i32 to vector<16x1xi32>
    %33 = arith.addi %22, %32 : vector<16x1xi32>
    %34 = arith.select %31, %33, %22 : vector<16x1xi1>, vector<16x1xi32>
    %c7_i32 = arith.constant 7 : i32
    %35 = vector.broadcast %c7_i32 : i32 to vector<16x1xi32>
    %36 = arith.cmpi ne, %34, %35 : vector<16x1xi32>
    %c0 = arith.constant 0 : index
    %c0_10 = arith.constant 0 : index
    %37 = vector.load %arg1[%c0, %c0_10] : memref<16x64xbf16, #tpu.memory_space<vmem>>, vector<16x64xbf16>
    %c0_11 = arith.constant 0 : index
    %c0_12 = arith.constant 0 : index
    %38 = vector.load %arg3[%c0_11, %c0_12] : memref<64x128xbf16, #tpu.memory_space<vmem>>, vector<64x128xbf16>
    %cst = arith.constant dense<0.000000e+00> : vector<16x128xf32>
    %39 = tpu.matmul %37, %38, %cst {dimension_numbers = #tpu.dot_dimension_numbers<[1], [0], [0], [1], [0, 0, 1, 1], [], []>} : vector<16x64xbf16>, vector<64x128xbf16>, vector<16x128xf32> -> vector<16x128xf32>
    %c0_13 = arith.constant 0 : index
    %c0_14 = arith.constant 0 : index
    %40 = vector.load %arg4[%c0_13, %c0_14] : memref<1x128xf32, #tpu.memory_space<vmem>>, vector<1x128xf32>
    %41 = vector.broadcast %40 : vector<1x128xf32> to vector<16x128xf32>
    %42 = arith.addf %39, %41 : vector<16x128xf32>
    %43 = arith.truncf %42 : vector<16x128xf32> to vector<16x128xbf16>
    %c0_15 = arith.constant 0 : index
    %c0_16 = arith.constant 0 : index
    %44 = vector.load %arg2[%c0_15, %c0_16] : memref<16x128xbf16, #tpu.memory_space<vmem>>, vector<16x128xbf16>
    %45 = tpu.concatenate %43, %44 in 1 : vector<16x128xbf16>, vector<16x128xbf16> -> vector<16x256xbf16>
    %c0_17 = arith.constant 0 : index
    %c0_18 = arith.constant 0 : index
    %46 = vector.load %arg5[%c0_17, %c0_18] : memref<256x384xbf16, #tpu.memory_space<vmem>>, vector<256x384xbf16>
    %cst_19 = arith.constant dense<0.000000e+00> : vector<16x384xf32>
    %47 = tpu.matmul %45, %46, %cst_19 {dimension_numbers = #tpu.dot_dimension_numbers<[1], [0], [0], [1], [0, 0, 1, 1], [], []>} : vector<16x256xbf16>, vector<256x384xbf16>, vector<16x384xf32> -> vector<16x384xf32>
    %48 = vector.extract_strided_slice %47 {offsets = [0, 128], sizes = [16, 128], strides = [1, 1]} : vector<16x384xf32> to vector<16x128xf32>
    %49 = vector.extract_strided_slice %47 {offsets = [0, 0], sizes = [16, 128], strides = [1, 1]} : vector<16x384xf32> to vector<16x128xf32>
    %c1_i32_20 = arith.constant 1 : i32
    %50 = tpu.dynamic_rotate %49 by %c1_i32_20 dim 0 : vector<16x128xf32>, i32 -> vector<16x128xf32>
    %cst_21 = arith.constant 0.000000e+00 : f32
    %51 = vector.shape_cast %18 : vector<16x1xi1> to vector<16x1xi1>
    %52 = vector.broadcast %51 : vector<16x1xi1> to vector<16x128xi1>
    %53 = vector.broadcast %cst_21 : f32 to vector<16x128xf32>
    %54 = arith.select %52, %50, %53 : vector<16x128xi1>, vector<16x128xf32>
    %55 = arith.addf %48, %54 : vector<16x128xf32>
    %56 = vector.extract_strided_slice %47 {offsets = [0, 256], sizes = [16, 128], strides = [1, 1]} : vector<16x384xf32> to vector<16x128xf32>
    %c15_i32 = arith.constant 15 : i32
    %57 = tpu.dynamic_rotate %56 by %c15_i32 dim 0 : vector<16x128xf32>, i32 -> vector<16x128xf32>
    %cst_22 = arith.constant 0.000000e+00 : f32
    %58 = vector.shape_cast %36 : vector<16x1xi1> to vector<16x1xi1>
    %59 = vector.broadcast %58 : vector<16x1xi1> to vector<16x128xi1>
    %60 = vector.broadcast %cst_22 : f32 to vector<16x128xf32>
    %61 = arith.select %59, %57, %60 : vector<16x128xi1>, vector<16x128xf32>
    %62 = arith.addf %55, %61 : vector<16x128xf32>
    %c0_23 = arith.constant 0 : index
    %c0_24 = arith.constant 0 : index
    %63 = vector.load %arg6[%c0_23, %c0_24] : memref<1x128xf32, #tpu.memory_space<vmem>>, vector<1x128xf32>
    %64 = vector.broadcast %63 : vector<1x128xf32> to vector<16x128xf32>
    %65 = arith.addf %62, %64 : vector<16x128xf32>
    %cst_25 = arith.constant 0.000000e+00 : f32
    %66 = vector.broadcast %cst_25 : f32 to vector<16x128xf32>
    %67 = arith.maximumf %65, %66 : vector<16x128xf32>
    %68 = arith.truncf %67 : vector<16x128xf32> to vector<16x128xbf16>
    %c0_26 = arith.constant 0 : index
    %c0_27 = arith.constant 0 : index
    %69 = vector.load %arg7[%c0_26, %c0_27] : memref<128x384xbf16, #tpu.memory_space<vmem>>, vector<128x384xbf16>
    %cst_28 = arith.constant dense<0.000000e+00> : vector<16x384xf32>
    %70 = tpu.matmul %68, %69, %cst_28 {dimension_numbers = #tpu.dot_dimension_numbers<[1], [0], [0], [1], [0, 0, 1, 1], [], []>} : vector<16x128xbf16>, vector<128x384xbf16>, vector<16x384xf32> -> vector<16x384xf32>
    %71 = vector.extract_strided_slice %70 {offsets = [0, 128], sizes = [16, 128], strides = [1, 1]} : vector<16x384xf32> to vector<16x128xf32>
    %72 = vector.extract_strided_slice %70 {offsets = [0, 0], sizes = [16, 128], strides = [1, 1]} : vector<16x384xf32> to vector<16x128xf32>
    %c1_i32_29 = arith.constant 1 : i32
    %73 = tpu.dynamic_rotate %72 by %c1_i32_29 dim 0 : vector<16x128xf32>, i32 -> vector<16x128xf32>
    %cst_30 = arith.constant 0.000000e+00 : f32
    %74 = vector.shape_cast %18 : vector<16x1xi1> to vector<16x1xi1>
    %75 = vector.broadcast %74 : vector<16x1xi1> to vector<16x128xi1>
    %76 = vector.broadcast %cst_30 : f32 to vector<16x128xf32>
    %77 = arith.select %75, %73, %76 : vector<16x128xi1>, vector<16x128xf32>
    %78 = arith.addf %71, %77 : vector<16x128xf32>
    %79 = vector.extract_strided_slice %70 {offsets = [0, 256], sizes = [16, 128], strides = [1, 1]} : vector<16x384xf32> to vector<16x128xf32>
    %c15_i32_31 = arith.constant 15 : i32
    %80 = tpu.dynamic_rotate %79 by %c15_i32_31 dim 0 : vector<16x128xf32>, i32 -> vector<16x128xf32>
    %cst_32 = arith.constant 0.000000e+00 : f32
    %81 = vector.shape_cast %36 : vector<16x1xi1> to vector<16x1xi1>
    %82 = vector.broadcast %81 : vector<16x1xi1> to vector<16x128xi1>
    %83 = vector.broadcast %cst_32 : f32 to vector<16x128xf32>
    %84 = arith.select %82, %80, %83 : vector<16x128xi1>, vector<16x128xf32>
    %85 = arith.addf %78, %84 : vector<16x128xf32>
    %c0_33 = arith.constant 0 : index
    %c0_34 = arith.constant 0 : index
    %86 = vector.load %arg8[%c0_33, %c0_34] : memref<1x128xf32, #tpu.memory_space<vmem>>, vector<1x128xf32>
    %87 = vector.broadcast %86 : vector<1x128xf32> to vector<16x128xf32>
    %88 = arith.addf %85, %87 : vector<16x128xf32>
    %cst_35 = arith.constant 0.000000e+00 : f32
    %89 = vector.broadcast %cst_35 : f32 to vector<16x128xf32>
    %90 = arith.maximumf %88, %89 : vector<16x128xf32>
    %91 = arith.truncf %90 : vector<16x128xf32> to vector<16x128xbf16>
    %c0_36 = arith.constant 0 : index
    %c0_37 = arith.constant 0 : index
    %92 = vector.load %arg9[%c0_36, %c0_37] : memref<16x128xbf16, #tpu.memory_space<vmem>>, vector<16x128xbf16>
    tpu.vector_store %arg9[%c0_36, %c0_37], %91 {strides = array<i32>} : memref<16x128xbf16, #tpu.memory_space<vmem>>, vector<16x128xbf16>,
    return
  }
  func.func @transform_0(%arg0: i32) -> (i32, i32) {
    %c0_i32 = arith.constant 0 : i32
    %c0_i32_0 = arith.constant 0 : i32
    %c0_i32_1 = arith.constant 0 : i32
    return %c0_i32, %c0_i32_0 : i32, i32
  }
  func.func @transform_1(%arg0: i32) -> (i32, i32) {
    %c0_i32 = arith.constant 0 : i32
    %c0_i32_0 = arith.constant 0 : i32
    %c0_i32_1 = arith.constant 0 : i32
    return %c0_i32, %c0_i32_0 : i32, i32
  }
  func.func @transform_2(%arg0: i32) -> (i32, i32) {
    %c0_i32 = arith.constant 0 : i32
    %c0_i32_0 = arith.constant 0 : i32
    %c0_i32_1 = arith.constant 0 : i32
    return %c0_i32, %c0_i32_0 : i32, i32
  }
  func.func @transform_3(%arg0: i32) -> (i32, i32) {
    %c0_i32 = arith.constant 0 : i32
    %c0_i32_0 = arith.constant 0 : i32
    %c0_i32_1 = arith.constant 0 : i32
    return %c0_i32, %c0_i32_0 : i32, i32
  }
  func.func @transform_4(%arg0: i32) -> (i32, i32) {
    %c0_i32 = arith.constant 0 : i32
    %c0_i32_0 = arith.constant 0 : i32
    %c0_i32_1 = arith.constant 0 : i32
    return %c0_i32, %c0_i32_0 : i32, i32
  }
  func.func @transform_5(%arg0: i32) -> (i32, i32) {
    %c0_i32 = arith.constant 0 : i32
    %c0_i32_0 = arith.constant 0 : i32
    %c0_i32_1 = arith.constant 0 : i32
    return %c0_i32, %c0_i32_0 : i32, i32
  }
  func.func @transform_6(%arg0: i32) -> (i32, i32) {
    %c0_i32 = arith.constant 0 : i32
    %c0_i32_0 = arith.constant 0 : i32
    %c0_i32_1 = arith.constant 0 : i32
    return %c0_i32, %c0_i32_0 : i32, i32
  }
  func.func @transform_7(%arg0: i32) -> (i32, i32) {
    %c0_i32 = arith.constant 0 : i32
    %c0_i32_0 = arith.constant 0 : i32
    %c0_i32_1 = arith.constant 0 : i32
    return %c0_i32, %c0_i32_0 : i32, i32
  }
  func.func @transform_8(%arg0: i32) -> (i32, i32) {
    %c0_i32 = arith.constant 0 : i32
    %c0_i32_0 = arith.constant 0 : i32
    %c0_i32_1 = arith.constant 0 : i32
    return %c0_i32, %c0_i32_0 : i32, i32
  }
}

</mosaic_0001>

<bundles_post_ra>
// kernel: source_decoder_forward.1
= control target key start
LH: loop header
LB: loop body
LE: loop exit
PB: predicated region body
PF: predicated region fallthrough
CT: control target
= control target key end

     0   :  { %v1152_v0 = vmov 0.0   ;;  %vm1153_vm0 = vmmov 0   ;;  %vm107_vm1 = vcmask 523264   ;;  %s1516_s2 = inlined_call_operand.vmem [shape: bf16[64,128], index: 2, kind: input, shape index: {}]   ;;  %s1517_s4 = inlined_call_operand.vmem [shape: bf16[256,384], index: 4, kind: input, shape index: {}]   ;;  %s1518_s0 = inlined_call_operand.vmem [shape: bf16[16,64], index: 0, kind: input, shape index: {}]   ;;  %s1519_s1 = inlined_call_operand.vmem [shape: bf16[16,128], index: 1, kind: input, shape index: {}]   ;;  %s1520_s6 = inlined_call_operand.vmem [shape: bf16[128,384], index: 6, kind: input, shape index: {}]   ;;  %s1521_s3 = inlined_call_operand.vmem [shape: f32[1,128], index: 3, kind: input, shape index: {}]   ;;  %s1522_s5 = inlined_call_operand.vmem [shape: f32[1,128], index: 5, kind: input, shape index: {}]   ;;  %s1523_s7 = inlined_call_operand.vmem [shape: f32[1,128], index: 7, kind: input, shape index: {}]   ;;  %s1524_s8 = inlined_call_operand.vmem [shape: bf16[16,128], index: 8, kind: output, shape index: {}]  }
   0x1   :  { %1015 = vmatprep.subr.bf16.mxu0 %v1152_v0  ;;  %v1050_v1 = vld [vmem:[%s1516_s2] sm:$0xff]   ;;  %1023 = vmatprep.mubr.msk.bf16.mxu0 %vm1153_vm0, %v1152_v0  ;;  %v1051_v2 = vld [vmem:[%s1516_s2 + $0x8] sm:$0xff]   ;;  %v1052_v3 = vld [vmem:[%s1516_s2 + $0x10] sm:$0xff]  }
   0x2   :  { %1016 = vmatpush3.bf16.msra.mxu0 %v1050_v1  ;;  %v1055_v4 = vld [vmem:[%s1517_s4 + $0x4] ss:$12 sps:$4 sm:$0xff]   ;;  %v1057_v5 = vld [vmem:[%s1517_s4] ss:$12 sps:$4 sm:$0xff]   ;;  %v1058_v6 = vld [vmem:[%s1517_s4 + $0x1c] ss:$12 sps:$4 sm:$0xff]  }
   0x3   :  { %1017 = vmatprep.subr.bf16.mxu0 %v1152_v0  ;;  %481 = vmatprep.subr.bf16.mxu1 %v1055_v4  ;;  %v1060_v7 = vld [vmem:[%s1517_s4 + $0x18] ss:$12 sps:$4 sm:$0xff]   ;;  %v1061_v8 = vld [vmem:[%s1517_s4 + $0x34] ss:$12 sps:$4 sm:$0xff]   ;;  %v1063_v11 = vld [vmem:[%s1517_s4 + $0x30] ss:$12 sps:$4 sm:$0xff]  }
   0x4   :  { %482 = vmatpush1.bf16.msra.mxu1 %v1057_v5  ;;  %v1053_v9 = vld [vmem:[%s1516_s2 + $0x18] sm:$0xff]   ;;  %v1054_v10 = vld [vmem:[%s1518_s0] sm:$0xff]   ;;  %v1066_v13 = vld [vmem:[%s1517_s4 + $0x48] ss:$12 sps:$4 sm:$0xff]  }
   0x5   :  { %483 = vmatprep.subr.bf16.mxu1 %v1058_v6  ;;  %v1064_v12 = vld [vmem:[%s1517_s4 + $0x4c] ss:$12 sps:$4 sm:$0xff]   ;;  %v1067_v14 = vld [vmem:[%s1517_s4 + $0x64] ss:$12 sps:$4 sm:$0xff]   ;;  %v1081_v15 = vld [vmem:[%s1517_s4 + $0xc8] ss:$12 sps:$4 sm:$0xff]  }
   0x6   :  { %1018 = vmatpush3.bf16.msra.mxu0 %v1051_v2  ;;  %v1083_v16 = vld [vmem:[%s1517_s4 + $0x8] ss:$12 sps:$4 sm:$0xff]   ;;  %v1069_v17 = vld [vmem:[%s1517_s4 + $0x60] ss:$12 sps:$4 sm:$0xff]   ;;  %v1072_v21 = vld [vmem:[%s1517_s4 + $0x78] ss:$12 sps:$4 sm:$0xff]  }
   0x7   :  { %1019 = vmatprep.subr.bf16.mxu0 %v1152_v0  ;;  %v1086_v18 = vld [vmem:[%s1517_s4 + $0xe0] ss:$12 sps:$4 sm:$0xff]   ;;  %v1070_v19 = vld [vmem:[%s1517_s4 + $0x7c] ss:$12 sps:$4 sm:$0xff]   ;;  %v1091_v23 = vld [vmem:[%s1517_s4 + $0xf8] ss:$12 sps:$4 sm:$0xff]  }
   0x8   :  { %484 = vmatpush1.bf16.msra.mxu1 %v1060_v7  ;;  %v1088_v20 = vld [vmem:[%s1517_s4 + $0x20] ss:$12 sps:$4 sm:$0xff]   ;;  %v1093_v24 = vld [vmem:[%s1517_s4 + $0x38] ss:$12 sps:$4 sm:$0xff]   ;;  %v1075_v25 = vld [vmem:[%s1517_s4 + $0x90] ss:$12 sps:$4 sm:$0xff]  }
   0x9   :  { %485 = vmatprep.subr.bf16.mxu1 %v1061_v8  ;;  %v1073_v22 = vld [vmem:[%s1517_s4 + $0x94] ss:$12 sps:$4 sm:$0xff]   ;;  %v1096_v26 = vld [vmem:[%s1517_s4 + $0x110] ss:$12 sps:$4 sm:$0xff]   ;;  %v1076_v28 = vld [vmem:[%s1517_s4 + $0xac] ss:$12 sps:$4 sm:$0xff]  }
   0xa   :  { %1020 = vmatpush3.bf16.msra.mxu0 %v1052_v3  ;;  %v1098_v27 = vld [vmem:[%s1517_s4 + $0x50] ss:$12 sps:$4 sm:$0xff]   ;;  %v1101_v29 = vld [vmem:[%s1517_s4 + $0x128] ss:$12 sps:$4 sm:$0xff]   ;;  %v1106_v33 = vld [vmem:[%s1517_s4 + $0x140] ss:$12 sps:$4 sm:$0xff]  }
   0xb   :  { %1021 = vmatprep.subr.bf16.mxu0 %v1152_v0  ;;  %v1078_v30 = vld [vmem:[%s1517_s4 + $0xa8] ss:$12 sps:$4 sm:$0xff]   ;;  %v1079_v32 = vld [vmem:[%s1517_s4 + $0xc4] ss:$12 sps:$4 sm:$0xff]   ;;  %v1082_v34 = vld [vmem:[%s1517_s4 + $0xc0] ss:$12 sps:$4 sm:$0xff]  }
   0xc   :  { %486 = vmatpush1.bf16.msra.mxu1 %v1063_v11  ;;  %v1103_v31 = vld [vmem:[%s1517_s4 + $0x68] ss:$12 sps:$4 sm:$0xff]   ;;  %v1108_v35 = vld [vmem:[%s1517_s4 + $0x80] ss:$12 sps:$4 sm:$0xff]   ;;  %v1111_v37 = vld [vmem:[%s1517_s4 + $0x158] ss:$12 sps:$4 sm:$0xff]  }
   0xd   :  { %487 = vmatprep.subr.bf16.mxu1 %v1064_v12  ;;  %v1084_v36 = vld [vmem:[%s1517_s4 + $0xdc] ss:$12 sps:$4 sm:$0xff]   ;;  %v1087_v38 = vld [vmem:[%s1517_s4 + $0xd8] ss:$12 sps:$4 sm:$0xff]   ;;  %v1089_v39 = vld [vmem:[%s1517_s4 + $0xf4] ss:$12 sps:$4 sm:$0xff]  }
   0xe   :  { %1022 = vmatpush3.bf16.msra.mxu0 %v1053_v9  ;;  %v1092_v40 = vld [vmem:[%s1517_s4 + $0xf0] ss:$12 sps:$4 sm:$0xff]   ;;  %v1094_v41 = vld [vmem:[%s1517_s4 + $0x10c] ss:$12 sps:$4 sm:$0xff]   ;;  %v1097_v42 = vld [vmem:[%s1517_s4 + $0x108] ss:$12 sps:$4 sm:$0xff]  }
   0xf   :  { %984 = vmatprep.subr.bf16.mxu0 %v1081_v15  ;;  %v1099_v43 = vld [vmem:[%s1517_s4 + $0x124] ss:$12 sps:$4 sm:$0xff]   ;;  %v1102_v44 = vld [vmem:[%s1517_s4 + $0x120] ss:$12 sps:$4 sm:$0xff]   ;;  %v1104_v45 = vld [vmem:[%s1517_s4 + $0x13c] ss:$12 sps:$4 sm:$0xff]  }
  0x10   :  { %488 = vmatpush1.bf16.msra.mxu1 %v1066_v13  ;;  %v1107_v46 = vld [vmem:[%s1517_s4 + $0x138] ss:$12 sps:$4 sm:$0xff]   ;;  %v1109_v47 = vld [vmem:[%s1517_s4 + $0x154] ss:$12 sps:$4 sm:$0xff]   ;;  %v1112_v48 = vld [vmem:[%s1517_s4 + $0x150] ss:$12 sps:$4 sm:$0xff]  }
  0x11   :  { %1024 = vmatmul.mubr.msk.bf16.vlgmr.msra.gmra.mrb[0].mxu0 %vm107_vm1, %v1054_v10  ;;  %489 = vmatprep.subr.bf16.mxu1 %v1067_v14  ;;  %v1113_v49 = vld [vmem:[%s1517_s4 + $0x98] ss:$12 sps:$4 sm:$0xff]   ;;  %v1116_v51 = vld [vmem:[%s1517_s4 + $0x170] ss:$12 sps:$4 sm:$0xff]   ;;  %v1117_v52 = vld [vmem:[%s1517_s4 + $0x168] ss:$12 sps:$4 sm:$0xff]  }
  0x12   :  { %985 = vmatpush3.bf16.msra.mxu0 %v1083_v16  ;;  %v1114_v50 = vld [vmem:[%s1517_s4 + $0x16c] ss:$12 sps:$4 sm:$0xff]   ;;  %v1118_v53 = vld [vmem:[%s1517_s4 + $0xb0] ss:$12 sps:$4 sm:$0xff]   ;;  %v1119_v54 = vld [vmem:[%s1519_s1] sm:$0xff]  }
  0x13   :  { %986 = vmatprep.subr.bf16.mxu0 %v1086_v18  ;;  %513 = vmatprep.mubr.bf16.mxu1 %v1119_v54  ;;  %v1122_v55 = vld [vmem:[%s1520_s6 + $0x4] ss:$12 sps:$4 sm:$0xff]   ;;  %v888_v56 = vld [vmem:[%s1521_s3] ss:$0 sm:$0xff]  ;;  %v1123_v1 = vld [vmem:[%s1520_s6 + $0x8] ss:$12 sps:$4 sm:$0xff]  }
  0x14   :  { %490 = vmatpush1.bf16.msra.mxu1 %v1069_v17  ;;  %556 = vmatprep.mubr.bf16.mxu0 %v1119_v54  ;;  %v1120_v63 = vld [vmem:[%s1520_s6] ss:$12 sps:$4 sm:$0xff]   ;;  %v1126_v3 = vld [vmem:[%s1520_s6 + $0x1c] ss:$12 sps:$4 sm:$0xff]   ;;  %v1124_v4 = vld [vmem:[%s1520_s6 + $0x18] ss:$12 sps:$4 sm:$0xff]  }
  0x15   :  { %491 = vmatprep.subr.bf16.mxu1 %v1070_v19  ;;  %v1127_v5 = vld [vmem:[%s1520_s6 + $0x20] ss:$12 sps:$4 sm:$0xff]   ;;  %v1128_v7 = vld [vmem:[%s1520_s6 + $0x30] ss:$12 sps:$4 sm:$0xff]   ;;  %v1131_v8 = vld [vmem:[%s1520_s6 + $0x38] ss:$12 sps:$4 sm:$0xff]  }
  0x16   :  { %987 = vmatpush3.bf16.msra.mxu0 %v1088_v20  ;;  %v1130_v6 = vld [vmem:[%s1520_s6 + $0x34] ss:$12 sps:$4 sm:$0xff]   ;;  %v1134_v9 = vld [vmem:[%s1520_s6 + $0x4c] ss:$12 sps:$4 sm:$0xff]   ;;  %v1135_v11 = vld [vmem:[%s1520_s6 + $0x50] ss:$12 sps:$4 sm:$0xff]  }
  0x17   :  { %988 = vmatprep.subr.bf16.mxu0 %v1091_v23  ;;  %v1132_v10 = vld [vmem:[%s1520_s6 + $0x48] ss:$12 sps:$4 sm:$0xff]   ;;  %v1138_v12 = vld [vmem:[%s1520_s6 + $0x64] ss:$12 sps:$4 sm:$0xff]   ;;  %v1136_v13 = vld [vmem:[%s1520_s6 + $0x60] ss:$12 sps:$4 sm:$0xff]  }
  0x18   :  { %492 = vmatpush1.bf16.msra.mxu1 %v1072_v21  ;;  %v1139_v14 = vld [vmem:[%s1520_s6 + $0x68] ss:$12 sps:$4 sm:$0xff]   ;;  %v1140_v16 = vld [vmem:[%s1520_s6 + $0x78] ss:$12 sps:$4 sm:$0xff]   ;;  %v1143_v17 = vld [vmem:[%s1520_s6 + $0x80] ss:$12 sps:$4 sm:$0xff]  }
  0x19   :  { %493 = vmatprep.subr.bf16.mxu1 %v1073_v22  ;;  %v1142_v15 = vld [vmem:[%s1520_s6 + $0x7c] ss:$12 sps:$4 sm:$0xff]   ;;  %v1146_v18 = vld [vmem:[%s1520_s6 + $0x94] ss:$12 sps:$4 sm:$0xff]   ;;  %v1147_v20 = vld [vmem:[%s1520_s6 + $0x98] ss:$12 sps:$4 sm:$0xff]  }
  0x1a   :  { %989 = vmatpush3.bf16.msra.mxu0 %v1093_v24  ;;  %v1144_v19 = vld [vmem:[%s1520_s6 + $0x90] ss:$12 sps:$4 sm:$0xff]   ;;  %v1148_v21 = vld [vmem:[%s1520_s6 + $0xa8] ss:$12 sps:$4 sm:$0xff]   ;;  %v1150_v22 = vld [vmem:[%s1520_s6 + $0xac] ss:$12 sps:$4 sm:$0xff]  }
  0x1b   :  { %990 = vmatprep.subr.bf16.mxu0 %v1096_v26  ;;  %v1151_v23 = vld [vmem:[%s1520_s6 + $0xb0] ss:$12 sps:$4 sm:$0xff]   ;;  %v1154_v24 = vmov 0  }
  0x1c   :  { %494 = vmatpush1.bf16.msra.mxu1 %v1075_v25  ;;  %v30_v25 = vlaneseq }
  0x1d   :  { %495 = vmatprep.subr.bf16.mxu1 %v1076_v28 }
  0x1e   :  { %991 = vmatpush3.bf16.msra.mxu0 %v1098_v27  ;;  %v1453_v26 = vshrl.u32 %v30_v25, 7 }
  0x1f   :  { %992 = vmatprep.subr.bf16.mxu0 %v1101_v29 }
  0x20   :  { %496 = vmatpush1.bf16.msra.mxu1 %v1078_v30  ;;  %v32_v27 = vadd.s32 8, %v1453_v26  ;;  %v37_v28 = vand.u32 7, %v1453_v26  ;;  %vm567_vm2 = vcmp.lt.s32.totalorder %v1453_v26, 1  ;;  %vm580_vm7 = vcmp.lt.s32.totalorder %v1453_v26, 7 }
  0x21   :  { %497 = vmatprep.subr.bf16.mxu1 %v1079_v32 }
  0x22   :  { %993 = vmatpush3.bf16.msra.mxu0 %v1103_v31  ;;  %v44_v29 = vand.u32 7, %v32_v27  ;;  %vm1458_vm3 = vcmp.ne.s32.totalorder %v37_v28, 0  ;;  %vm1474_vm6 = vcmp.ne.s32.totalorder %v37_v28, 7 }
  0x23   :  { %994 = vmatprep.subr.bf16.mxu0 %v1106_v33 }
  0x24   :  { %498 = vmatpush1.bf16.msra.mxu1 %v1082_v34  ;;  %vm1462_vm4 = vcmp.ne.s32.totalorder %v44_v29, 0  ;;  %vm1466_vm5 = vcmp.ne.s32.totalorder %v44_v29, 7 }
  0x25   :  { %499 = vmatprep.subr.bf16.mxu1 %v1084_v36 }
  0x26   :  { %995 = vmatpush3.bf16.msra.mxu0 %v1108_v35 }
  0x27   :  { %996 = vmatprep.subr.bf16.mxu0 %v1111_v37 }
  0x28   :  { %500 = vmatpush1.bf16.msra.mxu1 %v1087_v38 }
  0x29   :  { %501 = vmatprep.subr.bf16.mxu1 %v1089_v39 }
  0x2a   :  { %997 = vmatpush3.bf16.msra.mxu0 %v1113_v49 }
  0x2b   :  { %998 = vmatprep.subr.bf16.mxu0 %v1116_v51 }
  0x2c   :  { %502 = vmatpush1.bf16.msra.mxu1 %v1092_v40 }
  0x2d   :  { %503 = vmatprep.subr.bf16.mxu1 %v1094_v41 }
  0x2e   :  { %999 = vmatpush3.bf16.msra.mxu0 %v1118_v53 }
  0x2f   :  { %763 = vmatprep.subr.bf16.mxu0 %v1122_v55 }
  0x30   :  { %504 = vmatpush1.bf16.msra.mxu1 %v1097_v42 }
  0x31   :  { %505 = vmatprep.subr.bf16.mxu1 %v1099_v43 }
  0x34   :  { %506 = vmatpush1.bf16.msra.mxu1 %v1102_v44 }
  0x35   :  { %507 = vmatprep.subr.bf16.mxu1 %v1104_v45 }
  0x38   :  { %508 = vmatpush1.bf16.msra.mxu1 %v1107_v46 }
  0x39   :  { %509 = vmatprep.subr.bf16.mxu1 %v1109_v47 }
  0x3c   :  { %510 = vmatpush1.bf16.msra.mxu1 %v1112_v48 }
  0x3d   :  { %511 = vmatprep.subr.bf16.mxu1 %v1114_v50 }
  0x40   :  { %512 = vmatpush1.bf16.msra.mxu1 %v1117_v52 }
  0x41   :  { %1027 = vmatprep.subr.bf16.mxu1 %v1152_v0 }
  0xe4   :  { %v145_v57 = vpop.f32.mrb[0].mxu0 }
  0xe5   :  { %v1025_v58 = vpop.f32.mrb[1].mxu0  ;;  %v146_v60 = vadd.f32 %v888_v56, %v145_v57  ;;  %v944_v57 = vld [vmem:[%s1522_s5] ss:$0 sm:$0xff] }
  0xe6   :  { %v148_v59 = vpop.f32.mrb[2].mxu0 }
  0xe7   :  { %v149_v61 = vadd.f32 %v888_v56, %v148_v59  ;;  %v1026_v62 = vpop.f32.mrb[3].mxu0 }
  0xe9   :  { %v152_v2 = vpack.c.bf16 %v149_v61, %v146_v60 }
  0xeb   :  { %514 = vmatmul.mubr.bf16.vlgmr.msra.gmra.mrb[0].mxu1 %v152_v2  ;;  %557 = vmatmul.mubr.bf16.vlgmr.msra.gmra.mrb[4].mxu0 %v152_v2 }
  0xec   :  { %764 = vmatpush1.bf16.msra.mxu0 %v1120_v63  ;;  %1028 = vmatpush3.bf16.msra.mxu1 %v1123_v1 }
  0xed   :  { %765 = vmatprep.subr.bf16.mxu0 %v1126_v3  ;;  %1029 = vmatprep.subr.bf16.mxu1 %v1152_v0 }
  0xee   :  { %1043 = vmatprep.mubr.msk.bf16.mxu1 %vm1153_vm0, %v1152_v0  ;;  %795 = vmatprep.mubr.bf16.mxu0 %v1154_v24  ;;  %v969_v24 = vld [vmem:[%s1523_s7] ss:$0 sm:$0xff] }
  0xf0   :  { %766 = vmatpush1.bf16.msra.mxu0 %v1124_v4  ;;  %1030 = vmatpush3.bf16.msra.mxu1 %v1127_v5 }
  0xf1   :  { %767 = vmatprep.subr.bf16.mxu0 %v1130_v6  ;;  %1031 = vmatprep.subr.bf16.mxu1 %v1152_v0 }
  0xf4   :  { %768 = vmatpush1.bf16.msra.mxu0 %v1128_v7  ;;  %1032 = vmatpush3.bf16.msra.mxu1 %v1131_v8 }
  0xf5   :  { %769 = vmatprep.subr.bf16.mxu0 %v1134_v9  ;;  %1033 = vmatprep.subr.bf16.mxu1 %v1152_v0 }
  0xf8   :  { %770 = vmatpush1.bf16.msra.mxu0 %v1132_v10  ;;  %1034 = vmatpush3.bf16.msra.mxu1 %v1135_v11 }
  0xf9   :  { %1035 = vmatprep.subr.bf16.mxu1 %v1152_v0  ;;  %771 = vmatprep.subr.bf16.mxu0 %v1138_v12 }
  0xfc   :  { %772 = vmatpush1.bf16.msra.mxu0 %v1136_v13  ;;  %1036 = vmatpush3.bf16.msra.mxu1 %v1139_v14 }
  0xfd   :  { %1037 = vmatprep.subr.bf16.mxu1 %v1152_v0  ;;  %773 = vmatprep.subr.bf16.mxu0 %v1142_v15 }
 0x100   :  { %774 = vmatpush1.bf16.msra.mxu0 %v1140_v16  ;;  %1038 = vmatpush3.bf16.msra.mxu1 %v1143_v17 }
 0x101   :  { %1039 = vmatprep.subr.bf16.mxu1 %v1152_v0  ;;  %775 = vmatprep.subr.bf16.mxu0 %v1146_v18 }
 0x104   :  { %776 = vmatpush1.bf16.msra.mxu0 %v1144_v19  ;;  %1040 = vmatpush3.bf16.msra.mxu1 %v1147_v20 }
 0x105   :  { %1041 = vmatprep.subr.bf16.mxu1 %v1152_v0  ;;  %777 = vmatprep.subr.bf16.mxu0 %v1150_v22 }
 0x108   :  { %778 = vmatpush1.bf16.msra.mxu0 %v1148_v21  ;;  %1042 = vmatpush3.bf16.msra.mxu1 %v1151_v23 }
 0x1be   :  { %v515_v30 = vpop.f32.mrb[0].mxu1  ;;  %v1000_v31 = vpop.f32.mrb[4].mxu0 }
 0x1bf   :  { %v517_v0 = vpop.f32.mrb[1].mxu1  ;;  %v1001_v32 = vpop.f32.mrb[5].mxu0  ;;  %v565_v36 = vrot.slane %v515_v30, 7 }
 0x1c0   :  { %v1002_v33 = vadd.f32 %v1001_v32, %v1000_v31  ;;  %v519_v34 = vpop.f32.mrb[2].mxu1  ;;  %v1003_v35 = vpop.f32.mrb[6].mxu0 }
 0x1c1   :  { %v566_v38 = vrot.slane %v519_v34, 7  ;;  %v521_v40 = vpop.f32.mrb[3].mxu1  ;;  %v1004_v41 = vpop.f32.mrb[7].mxu0 }
 0x1c2   :  { %v1005_v43 = vadd.f32 %v1004_v41, %v1003_v35  ;;  %v578_v47 = vrot.slane %v1002_v33, 1 }
 0x1c3   :  { %v569_v44 = vsel %vm567_vm2, %v566_v38, %v565_v36  ;;  %v568_v45 = vsel %vm567_vm2, %v565_v36, %v566_v38 }
 0x1c4   :  { %v574_v48 = vsel %vm1458_vm3, %v569_v44, 0.0  ;;  %v575_v49 = vsel %vm1462_vm4, %v568_v45, 0.0  ;;  %v579_v50 = vrot.slane %v1005_v43, 1 }
 0x1c5   :  { %v576_v51 = vadd.f32 %v574_v48, %v517_v0  ;;  %v577_v52 = vadd.f32 %v575_v49, %v521_v40 }
 0x1c6   :  { %v581_v53 = vsel %vm580_vm7, %v578_v47, %v579_v50  ;;  %v582_v54 = vsel %vm580_vm7, %v579_v50, %v578_v47 }
 0x1c7   :  { %v587_v55 = vsel %vm1474_vm6, %v581_v53, 0.0  ;;  %v588_v56 = vsel %vm1466_vm5, %v582_v54, 0.0 }
 0x1c8   :  { %v589_v58 = vadd.f32 %v587_v55, %v576_v51  ;;  %v590_v59 = vadd.f32 %v588_v56, %v577_v52 }
 0x1ca   :  { %v598_v60 = vadd.f32 %v944_v57, %v589_v58  ;;  %v599_v61 = vadd.f32 %v944_v57, %v590_v59 }
 0x1cc   :  { %v600_v62 = vmax.f32 %v598_v60, 0.0  ;;  %v601_v63 = vmax.f32 %v599_v61, 0.0 }
 0x1ce   :  { %v602_v1 = vpack.c.bf16 %v601_v63, %v600_v62 }
 0x1d0   :  { %796 = vmatmul.mubr.bf16.vlgmr.msra.gmra.mrb[8].mxu0 %v602_v1  ;;  %1044 = vmatmul.mubr.bf16.vlgmr.msra.gmra.mrb[4].mxu1 %v602_v1 }
 0x2a3   :  { %v797_v2 = vpop.f32.mrb[8].mxu0  ;;  %v840_v3 = vpop.f32.mrb[4].mxu1 }
 0x2a4   :  { %v799_v4 = vpop.f32.mrb[9].mxu0  ;;  %v1045_v5 = vpop.f32.mrb[5].mxu1  ;;  %v847_v8 = vrot.slane %v797_v2, 7  ;;  %v855_v9 = vrot.slane %v840_v3, 1 }
 0x2a5   :  { %v801_v6 = vpop.f32.mrb[10].mxu0  ;;  %v843_v7 = vpop.f32.mrb[6].mxu1 }
 0x2a6   :  { %v848_v10 = vrot.slane %v801_v6, 7  ;;  %v856_v11 = vrot.slane %v843_v7, 1  ;;  %v803_v12 = vpop.f32.mrb[11].mxu0  ;;  %v1046_v13 = vpop.f32.mrb[7].mxu1 }
 0x2a8   :  { %v850_v14 = vsel %vm567_vm2, %v848_v10, %v847_v8  ;;  %v857_v15 = vsel %vm580_vm7, %v855_v9, %v856_v11  ;;  %v849_v16 = vsel %vm567_vm2, %v847_v8, %v848_v10  ;;  %v858_v17 = vsel %vm580_vm7, %v856_v11, %v855_v9 }
 0x2a9   :  { %v851_v18 = vsel %vm1458_vm3, %v850_v14, 0.0  ;;  %v852_v19 = vsel %vm1462_vm4, %v849_v16, 0.0  ;;  %v859_v22 = vsel %vm1474_vm6, %v857_v15, 0.0  ;;  %v860_v23 = vsel %vm1466_vm5, %v858_v17, 0.0 }
 0x2aa   :  { %v853_v20 = vadd.f32 %v851_v18, %v799_v4  ;;  %v854_v21 = vadd.f32 %v852_v19, %v803_v12 }
 0x2ac   :  { %v861_v25 = vadd.f32 %v859_v22, %v853_v20  ;;  %v862_v26 = vadd.f32 %v860_v23, %v854_v21 }
 0x2ae   :  { %v870_v27 = vadd.f32 %v969_v24, %v861_v25  ;;  %v871_v28 = vadd.f32 %v969_v24, %v862_v26 }
 0x2b0   :  { %v872_v29 = vmax.f32 %v870_v27, 0.0  ;;  %v873_v30 = vmax.f32 %v871_v28, 0.0 }
 0x2b2   :  { %v977_v31 = vpack.c.bf16 %v873_v30, %v872_v29 }
 0x2b4   :  { %978 = vst [vmem:[%s1524_s8] sm:$0xff] %v977_v31  }

</bundles_post_ra>
